<compile_context>
chip_gen: v7x
topology: tpu7x:2x2x1
jax: 0.10.0
libtpu: 0.0.40
codegen_flags: <defaults>
</compile_context>

<pallas_src>
import jax
import jax.numpy as jnp
from jax.experimental import pallas as pl
from jax.experimental.pallas import tpu as pltpu

BN_EPS = 1e-5
LANE = 128

_VMEM_LIMIT_CACHE = [None]


def _round_up(x, m):
    return (x + m - 1) // m * m


def _vmem_limit_bytes():
    """Generation-aware VMEM budget (v7x has 64 MiB/TC vs 128 MiB on v5e/v6e)."""
    if _VMEM_LIMIT_CACHE[0] is None:
        try:
            cap = pltpu.get_tpu_info().vmem_capacity_bytes
            _VMEM_LIMIT_CACHE[0] = min(int(cap * 0.7), 100 * 1024 * 1024)
        except Exception:
            _VMEM_LIMIT_CACHE[0] = 48 * 1024 * 1024
    return _VMEM_LIMIT_CACHE[0]


def _compiler_params():
    return pltpu.CompilerParams(
        dimension_semantics=("parallel",),
        vmem_limit_bytes=_vmem_limit_bytes())


def _choose_tm(m):
    """M tile: multiple of 16 (bf16 sublane packing); >=2 grid steps when the
    problem allows, so the parallel M axis can split across v7x's two TCs."""
    if m <= 16:
        return 16
    if m <= 1024:
        return _round_up((m + 1) // 2, 16)
    return 512


# ----------------------------- Pallas kernels ------------------------------

def _conv_mm_stats_kernel(p_ref, w_ref, y_ref, s_ref):
    """y = p @ w (bf16 x bf16, f32 acc) stored as bf16; emit f32 per-channel
    per-tile [sum, sumsq] from the f32 accumulator (training-mode BN stats)."""
    y = jnp.dot(p_ref[...], w_ref[...], preferred_element_type=jnp.float32)
    y_ref[...] = y.astype(y_ref.dtype)
    ssum = jnp.sum(y, axis=0, keepdims=True)        # (1, width)
    ssq = jnp.sum(y * y, axis=0, keepdims=True)     # (1, width)
    s_ref[...] = jnp.concatenate([ssum, ssq], axis=0)[None]   # (1, 2, width)


def _bn_relu_add_kernel(y_ref, sc_ref, sh_ref, r_ref, o_ref):
    """out = relu(y * scale + shift) + res   (identity shortcut)."""
    y = y_ref[...].astype(jnp.float32)
    out = jnp.maximum(y * sc_ref[...] + sh_ref[...], 0.0)
    o_ref[...] = out + r_ref[...].astype(jnp.float32)


def _bn_relu_bnres_kernel(y_ref, sc_ref, sh_ref, r_ref, rsc_ref, rsh_ref, o_ref):
    """out = relu(y * scale + shift) + (res * rscale + rshift)  (downsample)."""
    y = y_ref[...].astype(jnp.float32)
    out = jnp.maximum(y * sc_ref[...] + sh_ref[...], 0.0)
    r = r_ref[...].astype(jnp.float32)
    o_ref[...] = out + (r * rsc_ref[...] + rsh_ref[...])


# --------------------------- pallas_call wrappers ---------------------------

def conv_matmul_stats(patches, w_mat, tm):
    """(Mp,Kp)@(Kp,W) -> y (Mp,W) bf16 and per-tile stats (grid_m,2,W) f32."""
    mp, kp = patches.shape
    width = w_mat.shape[1]
    grid_m = mp // tm
    return pl.pallas_call(
        _conv_mm_stats_kernel,
        out_shape=(jax.ShapeDtypeStruct((mp, width), jnp.bfloat16),
                   jax.ShapeDtypeStruct((grid_m, 2, width), jnp.float32)),
        grid_spec=pltpu.PrefetchScalarGridSpec(
            num_scalar_prefetch=0,
            grid=(grid_m,),
            in_specs=[pl.BlockSpec((tm, kp), lambda i: (i, 0)),
                      pl.BlockSpec((kp, width), lambda i: (0, 0))],  # resident
            out_specs=[pl.BlockSpec((tm, width), lambda i: (i, 0)),
                       pl.BlockSpec((1, 2, width), lambda i: (i, 0, 0))]),
        compiler_params=_compiler_params(),
    )(patches, w_mat)


def bn_relu_residual(y, scale, shift, res, res_col, rscale, rshift, tm):
    """Fused epilogue.  `res_col` selects which Cp-wide column block of `res`
    holds the shortcut (1 -> second half of the fused conv1 output)."""
    mp, cp = y.shape
    grid_m = mp // tm
    y_spec = pl.BlockSpec((tm, cp), lambda i: (i, 0))
    vec_spec = pl.BlockSpec((1, cp), lambda i: (0, 0))
    res_spec = pl.BlockSpec((tm, cp), lambda i, c=res_col: (i, c))
    if rscale is None:
        kernel = _bn_relu_add_kernel
        in_specs = [y_spec, vec_spec, vec_spec, res_spec]
        args = (y, scale, shift, res)
    else:
        kernel = _bn_relu_bnres_kernel
        in_specs = [y_spec, vec_spec, vec_spec, res_spec, vec_spec, vec_spec]
        args = (y, scale, shift, res, rscale, rshift)
    return pl.pallas_call(
        kernel,
        out_shape=jax.ShapeDtypeStruct((mp, cp), jnp.float32),
        grid_spec=pltpu.PrefetchScalarGridSpec(
            num_scalar_prefetch=0,
            grid=(grid_m,),
            in_specs=in_specs,
            out_specs=pl.BlockSpec((tm, cp), lambda i: (i, 0))),
        compiler_params=_compiler_params(),
    )(*args)


# ------------------------------- JAX glue -----------------------------------

def _im2col(x_nhwc, ksize, stride, pad):
    """(N,H,W,C) -> (N*Ho*Wo, ksize*ksize*C) patch matrix (kh,kw,C ordering)."""
    N, H, W, C = x_nhwc.shape
    xp = jnp.pad(x_nhwc, ((0, 0), (pad, pad), (pad, pad), (0, 0)))
    Ho = (H + 2 * pad - ksize) // stride + 1
    Wo = (W + 2 * pad - ksize) // stride + 1
    cols = []
    for kh in range(ksize):
        for kw in range(ksize):
            cols.append(
                xp[:, kh:kh + Ho * stride:stride, kw:kw + Wo * stride:stride, :])
    patches = jnp.concatenate(cols, axis=-1)
    return patches.reshape(N * Ho * Wo, ksize * ksize * C), (Ho, Wo)


def _w_to_mat(w_oihw):
    """torch conv weight (Cout,Cin,kh,kw) -> (kh*kw*Cin, Cout) matching im2col."""
    return jnp.transpose(w_oihw, (2, 3, 1, 0)).reshape(-1, w_oihw.shape[0])


def _pad2(x, rows, cols):
    r, c = x.shape
    return jnp.pad(x, ((0, rows - r), (0, cols - c)))


def _bn_scale_shift(sums, m_true, gamma, beta, cp):
    """Per-channel BN affine from f32 (2,cp) [sum,sumsq]; biased var, eps=1e-5."""
    mean = sums[0] / m_true
    var = jnp.maximum(sums[1] / m_true - mean * mean, 0.0)
    gp = jnp.pad(gamma, (0, cp - gamma.shape[0]))
    bp = jnp.pad(beta, (0, cp - beta.shape[0]))
    scale = gp * jax.lax.rsqrt(var + BN_EPS)
    shift = bp - mean * scale
    return scale.reshape(1, cp), shift.reshape(1, cp)


def basic_block_forward(x_nchw, params, stride):
    N, Cin, H, W = x_nchw.shape
    Cout = params["w1"].shape[0]
    if stride == 1:
        assert Cin == Cout, "identity shortcut requires in_channels == inside_channels"

    x_nhwc = jnp.transpose(x_nchw, (0, 2, 3, 1)).astype(jnp.float32)

    Ho = (H + 2 - 3) // stride + 1
    Wo = (W + 2 - 3) // stride + 1
    M = N * Ho * Wo                     # shared by conv1 / conv2 / shortcut
    Cp = _round_up(Cout, LANE)          # lane-dense channel dim
    TM = _choose_tm(M)
    Mp = _round_up(M, TM)

    # ---- conv1 (3x3, pad=1, stride=s) [+ fused 1x1 downsample] --------------
    p1, _ = _im2col(x_nhwc, 3, stride, 1)                # (M, 9*Cin)
    Kp1 = _round_up(p1.shape[1], LANE)
    p1 = _pad2(p1, Mp, Kp1).astype(jnp.bfloat16)
    w1m = _pad2(_w_to_mat(params["w1"]), Kp1, Cp)
    if stride != 1:
        # The 1x1/stride-s downsample patch matrix equals the center-tap
        # (kh=kw=1) columns of p1, so fold wd in as extra output columns.
        wd2d = params["wd"][:, :, 0, 0].T                # (Cin, Cout)
        wdm = jnp.zeros((Kp1, Cp), jnp.float32)
        wdm = wdm.at[4 * Cin:5 * Cin, :Cout].set(wd2d)
        wmat = jnp.concatenate([w1m, wdm], axis=1)       # (Kp1, 2*Cp)
    else:
        wmat = w1m
    y1r, st1 = conv_matmul_stats(p1, wmat.astype(jnp.bfloat16), TM)
    st1sum = jnp.sum(st1, axis=0)                        # (2, width) f32
    sc1, sh1 = _bn_scale_shift(st1sum[:, :Cp], M, params["g1"], params["b1"], Cp)

    # ---- bn1 + relu1 fused into conv2's patch construction -------------------
    # (applied to the bf16 y1 and folded by XLA into the im2col slices; no
    #  standalone BN-apply pass, no f32 out1 round trip through HBM)
    out1 = jnp.maximum(
        y1r[:M, :Cout].astype(jnp.float32) * sc1[0, :Cout] + sh1[0, :Cout], 0.0)
    out1_nhwc = out1.reshape(N, Ho, Wo, Cout)

    # ---- conv2 (3x3, pad=1, stride=1) + bn2 stats -----------------------------
    p2, _ = _im2col(out1_nhwc, 3, 1, 1)                  # (M, 9*Cout)
    Kp2 = _round_up(p2.shape[1], LANE)
    p2 = _pad2(p2, Mp, Kp2).astype(jnp.bfloat16)
    w2m = _pad2(_w_to_mat(params["w2"]), Kp2, Cp).astype(jnp.bfloat16)
    y2, st2 = conv_matmul_stats(p2, w2m, TM)
    sc2, sh2 = _bn_scale_shift(jnp.sum(st2, axis=0), M,
                               params["g2"], params["b2"], Cp)

    # ---- fused epilogue: relu(bn2(y2)) + shortcut -----------------------------
    if stride != 1:
        rsc, rsh = _bn_scale_shift(st1sum[:, Cp:], M,
                                   params["gd"], params["bd"], Cp)
        out = bn_relu_residual(y2, sc2, sh2, y1r, 1, rsc, rsh, TM)
    else:
        res = _pad2(x_nhwc.reshape(M, Cin), Mp, Cp).astype(jnp.bfloat16)
        out = bn_relu_residual(y2, sc2, sh2, res, 0, None, None, TM)

    out = out[:M, :Cout].reshape(N, Ho, Wo, Cout)
    return jnp.transpose(out, (0, 3, 1, 2))


# --------------------------- parameters (synthetic) --------------------------

def init_params(key, in_ch, inside_ch, stride):
    k1, k2, k3 = jax.random.split(key, 3)

    def kaiming_uniform(k, shape):
        fan_in = shape[1] * shape[2] * shape[3]
        bound = (1.0 / fan_in) ** 0.5 * (3.0 ** 0.5)
        return jax.random.uniform(k, shape, jnp.float32, -bound, bound)

    params = {
        "w1": kaiming_uniform(k1, (inside_ch, in_ch, 3, 3)),
        "g1": jnp.ones((inside_ch,), jnp.float32),
        "b1": jnp.zeros((inside_ch,), jnp.float32),
        "w2": kaiming_uniform(k2, (inside_ch, inside_ch, 3, 3)),
        "g2": jnp.ones((inside_ch,), jnp.float32),
        "b2": jnp.zeros((inside_ch,), jnp.float32),
    }
    if stride != 1:
        bound = (6.0 / (in_ch + inside_ch)) ** 0.5          # xavier_uniform
        params["wd"] = jax.random.uniform(
            k3, (inside_ch, in_ch, 1, 1), jnp.float32, -bound, bound)
        params["gd"] = jnp.ones((inside_ch,), jnp.float32)
        params["bd"] = jnp.zeros((inside_ch,), jnp.float32)
    return params


# ------------------------------ pure-JAX reference ---------------------------
# Mirrors the kernels' precision policy (bf16 conv inputs/weights and bf16
# intermediate storage, f32 accumulation and f32 BN statistics) so the only
# residual divergence is f32 accumulation order.

def _round_bf16(x):
    return x.astype(jnp.bfloat16).astype(jnp.float32)


def _ref_conv(x, w, stride, pad):
    return jax.lax.conv_general_dilated(
        _round_bf16(x), _round_bf16(w), window_strides=(stride, stride),
        padding=((pad, pad), (pad, pad)),
        dimension_numbers=("NCHW", "OIHW", "NCHW"),
        precision=jax.lax.Precision.HIGHEST)


def _ref_bn(y, g, b):
    mean = jnp.mean(y, axis=(0, 2, 3), keepdims=True)
    var = jnp.mean((y - mean) ** 2, axis=(0, 2, 3), keepdims=True)
    scale = g.reshape(1, -1, 1, 1) * jax.lax.rsqrt(var + BN_EPS)
    shift = b.reshape(1, -1, 1, 1) - mean * scale
    return _round_bf16(y) * scale + shift     # affine applied to bf16-stored y


def basic_block_reference(x, params, stride):
    out = jnp.maximum(_ref_bn(_ref_conv(x, params["w1"], stride, 1),
                              params["g1"], params["b1"]), 0.0)
    out = jnp.maximum(_ref_bn(_ref_conv(out, params["w2"], 1, 1),
                              params["g2"], params["b2"]), 0.0)
    if stride != 1:
        inp = _ref_bn(_ref_conv(x, params["wd"], stride, 0),
                      params["gd"], params["bd"])
    else:
        inp = _round_bf16(x)
    return out + inp


# ---------------------------------- demo -------------------------------------

if __name__ == "__main__":
    key = jax.random.PRNGKey(0)
    kx, kp1, kp2 = jax.random.split(key, 3)
    x = jax.random.normal(kx, (2, 4, 16, 16), jnp.float32)

    fwd = jax.jit(basic_block_forward, static_argnums=2)

    # stride=1, identity shortcut (in_channels == inside_channels)
    params1 = init_params(kp1, 4, 4, stride=1)
    y1 = jax.block_until_ready(fwd(x, params1, 1))
    r1 = basic_block_reference(x, params1, 1)
    assert y1.shape == (2, 4, 16, 16)
    assert jnp.allclose(y1, r1, atol=2e-2, rtol=2e-2), "stride=1 mismatch"

    # stride=2, downsample (1x1 conv + BN) shortcut fused into conv1
    params2 = init_params(kp2, 4, 8, stride=2)
    y2 = jax.block_until_ready(fwd(x, params2, 2))
    r2 = basic_block_reference(x, params2, 2)
    assert y2.shape == (2, 8, 8, 8)
    assert jnp.allclose(y2, r2, atol=2e-2, rtol=2e-2), "stride=2 mismatch"

    print("KERNEL_OK")
</pallas_src>

<mosaic_0001>
module attributes {stable_mosaic.version = 11 : i64} {
  func.func @_conv_mm_stats_kernel(%arg0: i32, %arg1: memref<256x128xbf16, #tpu.memory_space<vmem>>, %arg2: memref<128x128xbf16, #tpu.memory_space<vmem>>, %arg3: memref<256x128xbf16, #tpu.memory_space<vmem>>, %arg4: memref<1x2x128xf32, #tpu.memory_space<vmem>>) attributes {dimension_semantics = [#tpu.dimension_semantics<parallel>], iteration_bounds = array<i64: 2>, scalar_prefetch = 0 : i64, scratch_operands = 0 : i64, tpu.core_type = #tpu.core_type<tc>, window_params = [{transform_indices = @transform_0, window_bounds = array<i64: 256, 128>}, {pipeline_mode = #tpu.pipeline_mode<synchronous>, transform_indices = @transform_1, window_bounds = array<i64: 128, 128>}, {transform_indices = @transform_2, window_bounds = array<i64: 256, 128>}, {transform_indices = @transform_3, window_bounds = array<i64: 1, 2, 128>}]} {
    %c0 = arith.constant 0 : index
    %c0_0 = arith.constant 0 : index
    %0 = vector.load %arg1[%c0, %c0_0] : memref<256x128xbf16, #tpu.memory_space<vmem>>, vector<256x128xbf16>
    %c0_1 = arith.constant 0 : index
    %c0_2 = arith.constant 0 : index
    %1 = vector.load %arg2[%c0_1, %c0_2] : memref<128x128xbf16, #tpu.memory_space<vmem>>, vector<128x128xbf16>
    %cst = arith.constant dense<0.000000e+00> : vector<256x128xf32>
    %2 = tpu.matmul %0, %1, %cst {dimension_numbers = #tpu.dot_dimension_numbers<[1], [0], [0], [1], [0, 0, 1, 1], [], []>} : vector<256x128xbf16>, vector<128x128xbf16>, vector<256x128xf32> -> vector<256x128xf32>
    %3 = arith.truncf %2 : vector<256x128xf32> to vector<256x128xbf16>
    %c0_3 = arith.constant 0 : index
    %c0_4 = arith.constant 0 : index
    %4 = vector.load %arg3[%c0_3, %c0_4] : memref<256x128xbf16, #tpu.memory_space<vmem>>, vector<256x128xbf16>
    tpu.vector_store %arg3[%c0_3, %c0_4], %3 {strides = array<i32>} : memref<256x128xbf16, #tpu.memory_space<vmem>>, vector<256x128xbf16>,
    %cst_5 = arith.constant dense<0.000000e+00> : vector<128xf32>
    %5 = vector.multi_reduction <add>, %2, %cst_5 [0] : vector<256x128xf32> to vector<128xf32>
    %6 = vector.shape_cast %5 : vector<128xf32> to vector<1x128xf32>
    %7 = arith.mulf %2, %2 : vector<256x128xf32>
    %cst_6 = arith.constant dense<0.000000e+00> : vector<128xf32>
    %8 = vector.multi_reduction <add>, %7, %cst_6 [0] : vector<256x128xf32> to vector<128xf32>
    %9 = vector.shape_cast %8 : vector<128xf32> to vector<1x128xf32>
    %10 = tpu.concatenate %6, %9 in 0 : vector<1x128xf32>, vector<1x128xf32> -> vector<2x128xf32>
    %11 = vector.shape_cast %10 : vector<2x128xf32> to vector<1x2x128xf32>
    %c0_7 = arith.constant 0 : index
    %c0_8 = arith.constant 0 : index
    %c0_9 = arith.constant 0 : index
    %12 = vector.load %arg4[%c0_7, %c0_8, %c0_9] : memref<1x2x128xf32, #tpu.memory_space<vmem>>, vector<1x2x128xf32>
    tpu.vector_store %arg4[%c0_7, %c0_8, %c0_9], %11 {strides = array<i32>} : memref<1x2x128xf32, #tpu.memory_space<vmem>>, vector<1x2x128xf32>,
    return
  }
  func.func @transform_0(%arg0: i32) -> (i32, i32) {
    %c0_i32 = arith.constant 0 : i32
    %c0_i32_0 = arith.constant 0 : i32
    return %arg0, %c0_i32 : i32, i32
  }
  func.func @transform_1(%arg0: i32) -> (i32, i32) {
    %c0_i32 = arith.constant 0 : i32
    %c0_i32_0 = arith.constant 0 : i32
    %c0_i32_1 = arith.constant 0 : i32
    return %c0_i32, %c0_i32_0 : i32, i32
  }
  func.func @transform_2(%arg0: i32) -> (i32, i32) {
    %c0_i32 = arith.constant 0 : i32
    %c0_i32_0 = arith.constant 0 : i32
    return %arg0, %c0_i32 : i32, i32
  }
  func.func @transform_3(%arg0: i32) -> (i32, i32, i32) {
    %c0_i32 = arith.constant 0 : i32
    %c0_i32_0 = arith.constant 0 : i32
    %c0_i32_1 = arith.constant 0 : i32
    return %arg0, %c0_i32, %c0_i32_0 : i32, i32, i32
  }
}

module attributes {stable_mosaic.version = 11 : i64} {
  func.func @_bn_relu_add_kernel(%arg0: i32, %arg1: memref<256x128xbf16, #tpu.memory_space<vmem>>, %arg2: memref<1x128xf32, #tpu.memory_space<vmem>>, %arg3: memref<1x128xf32, #tpu.memory_space<vmem>>, %arg4: memref<256x128xbf16, #tpu.memory_space<vmem>>, %arg5: memref<256x128xf32, #tpu.memory_space<vmem>>) attributes {dimension_semantics = [#tpu.dimension_semantics<parallel>], iteration_bounds = array<i64: 2>, scalar_prefetch = 0 : i64, scratch_operands = 0 : i64, tpu.core_type = #tpu.core_type<tc>, window_params = [{transform_indices = @transform_0, window_bounds = array<i64: 256, 128>}, {pipeline_mode = #tpu.pipeline_mode<synchronous>, transform_indices = @transform_1, window_bounds = array<i64: 1, 128>}, {pipeline_mode = #tpu.pipeline_mode<synchronous>, transform_indices = @transform_2, window_bounds = array<i64: 1, 128>}, {transform_indices = @transform_3, window_bounds = array<i64: 256, 128>}, {transform_indices = @transform_4, window_bounds = array<i64: 256, 128>}]} {
    %c0 = arith.constant 0 : index
    %c0_0 = arith.constant 0 : index
    %0 = vector.load %arg1[%c0, %c0_0] : memref<256x128xbf16, #tpu.memory_space<vmem>>, vector<256x128xbf16>
    %1 = arith.extf %0 : vector<256x128xbf16> to vector<256x128xf32>
    %c0_1 = arith.constant 0 : index
    %c0_2 = arith.constant 0 : index
    %2 = vector.load %arg2[%c0_1, %c0_2] : memref<1x128xf32, #tpu.memory_space<vmem>>, vector<1x128xf32>
    %3 = vector.broadcast %2 : vector<1x128xf32> to vector<256x128xf32>
    %4 = arith.mulf %1, %3 : vector<256x128xf32>
    %c0_3 = arith.constant 0 : index
    %c0_4 = arith.constant 0 : index
    %5 = vector.load %arg3[%c0_3, %c0_4] : memref<1x128xf32, #tpu.memory_space<vmem>>, vector<1x128xf32>
    %6 = vector.broadcast %5 : vector<1x128xf32> to vector<256x128xf32>
    %7 = arith.addf %4, %6 : vector<256x128xf32>
    %cst = arith.constant 0.000000e+00 : f32
    %8 = vector.broadcast %cst : f32 to vector<256x128xf32>
    %9 = arith.maximumf %7, %8 : vector<256x128xf32>
    %c0_5 = arith.constant 0 : index
    %c0_6 = arith.constant 0 : index
    %10 = vector.load %arg4[%c0_5, %c0_6] : memref<256x128xbf16, #tpu.memory_space<vmem>>, vector<256x128xbf16>
    %11 = arith.extf %10 : vector<256x128xbf16> to vector<256x128xf32>
    %12 = arith.addf %9, %11 : vector<256x128xf32>
    %c0_7 = arith.constant 0 : index
    %c0_8 = arith.constant 0 : index
    %13 = vector.load %arg5[%c0_7, %c0_8] : memref<256x128xf32, #tpu.memory_space<vmem>>, vector<256x128xf32>
    tpu.vector_store %arg5[%c0_7, %c0_8], %12 {strides = array<i32>} : memref<256x128xf32, #tpu.memory_space<vmem>>, vector<256x128xf32>,
    return
  }
  func.func @transform_0(%arg0: i32) -> (i32, i32) {
    %c0_i32 = arith.constant 0 : i32
    %c0_i32_0 = arith.constant 0 : i32
    return %arg0, %c0_i32 : i32, i32
  }
  func.func @transform_1(%arg0: i32) -> (i32, i32) {
    %c0_i32 = arith.constant 0 : i32
    %c0_i32_0 = arith.constant 0 : i32
    %c0_i32_1 = arith.constant 0 : i32
    return %c0_i32, %c0_i32_0 : i32, i32
  }
  func.func @transform_2(%arg0: i32) -> (i32, i32) {
    %c0_i32 = arith.constant 0 : i32
    %c0_i32_0 = arith.constant 0 : i32
    %c0_i32_1 = arith.constant 0 : i32
    return %c0_i32, %c0_i32_0 : i32, i32
  }
  func.func @transform_3(%arg0: i32) -> (i32, i32) {
    %c0_i32 = arith.constant 0 : i32
    %c0_i32_0 = arith.constant 0 : i32
    return %arg0, %c0_i32 : i32, i32
  }
  func.func @transform_4(%arg0: i32) -> (i32, i32) {
    %c0_i32 = arith.constant 0 : i32
    %c0_i32_0 = arith.constant 0 : i32
    return %arg0, %c0_i32 : i32, i32
  }
}

</mosaic_0001>

<bundles_post_ra>
// kernel: basic_block_forward.3
= control target key start
LH: loop header
LB: loop body
LE: loop exit
PB: predicated region body
PF: predicated region fallthrough
CT: control target
= control target key end

     0   :  { %s1238_s12 = smov 0   ;;  %s1414_s0 = inlined_call_operand.vmem [shape: bf16[512,128], index: 0, kind: input, shape index: {}]   ;;  %s1415_s1 = inlined_call_operand.vmem [shape: bf16[128,128], index: 1, kind: input, shape index: {}]   ;;  %s1416_s2 = inlined_call_operand.vmem [shape: bf16[512,128], index: 2, kind: output, shape index: {0}]   ;;  %s1417_s3 = inlined_call_operand.vmem [shape: f32[2,2,128], index: 3, kind: output, shape index: {1}]  }
   0x1 LB: > { %s1244_s13 = sadd.s32 4294967295, %s1216_s12   ;;  %p899_p0 = scmp.ge.s32.totalorder %s1216_s12, 1  ;;  %s1216_s12 = sphi %s1238_s12, %s14_s12  }
   0x2   : > { %p141_p1 = scmp.lt.s32.totalorder %s1216_s12, 3 }
   0x4   : > { %p142_p2 = pnand %p899_p0, %p141_p1 }
   0x5   : > { %v1186_v0 = vld [vmem:[%s1415_s1] sm:$0xff] (!%p142_p2)   ;;  %s900_s16 = sshll.u32 (!%p142_p2), %s1244_s13, 5  ;;  %v1187_v1 = vld [vmem:[%s1415_s1 + $0x8] sm:$0xff] (!%p142_p2)   ;;  %v1188_v2 = vld [vmem:[%s1415_s1 + $0x10] sm:$0xff] (!%p142_p2)   ;;  %p181_p4 = scmp.lt.s32.totalorder (!%p142_p2), %s1244_s13, 1  ;;  %vm805_vm0 = vcmask (!%p142_p2), 1040384  }
   0x6   : > { %145 = sbr.rel (%p142_p2) target bundleno = 331 (0x14b), region = 28  ;;  %p170_p3 = scmp.lt.s32.totalorder (!%p142_p2), %s900_s16, 63  ;;  %1114 = vmatprep.subr.bf16.mxu0 (!%p142_p2), %v1186_v0  ;;  %1162 = vmatprep.subr.bf16.mxu1 (!%p142_p2), %v1186_v0  ;;  %v1189_v3 = vld [vmem:[%s1415_s1 + $0x18] sm:$0xff] (!%p142_p2)   ;;  %v1190_v5 = vld [vmem:[%s1415_s1 + $0x20] sm:$0xff] (!%p142_p2)   ;;  %v1191_v6 = vld [vmem:[%s1415_s1 + $0x28] sm:$0xff] (!%p142_p2)  }
   0x7   : > { %1115 = vmatpush3.bf16.msra.mxu0 (!%p142_p2), %v1186_v0  ;;  %1170 = vmatpush3.bf16.msra.mxu1 (!%p142_p2), %v1186_v0  ;;  %v1192_v8 = vld [vmem:[%s1415_s1 + $0x30] sm:$0xff] (!%p142_p2)   ;;  %v1193_v9 = vld [vmem:[%s1415_s1 + $0x38] sm:$0xff] (!%p142_p2)  }
   0x8   : > { %1116 = vmatprep.subr.bf16.mxu0 (!%p142_p2), %v1187_v1  ;;  %1163 = vmatprep.subr.bf16.mxu1 (!%p142_p2), %v1187_v1 }
   0xb   : > { %1117 = vmatpush3.bf16.msra.mxu0 (!%p142_p2), %v1187_v1  ;;  %1171 = vmatpush3.bf16.msra.mxu1 (!%p142_p2), %v1187_v1 }
   0xc   : > { %1118 = vmatprep.subr.bf16.mxu0 (!%p142_p2), %v1188_v2  ;;  %1164 = vmatprep.subr.bf16.mxu1 (!%p142_p2), %v1188_v2 }
   0xd   : > { %s1419_s16 = smov (!%p170_p3, %s900_s16), 63  ;;  %s1421_s13 = smov (!%p181_p4, %s1244_s13), 1 }
   0xe   : > { %s901_s21 = sshll.u32 %s1419_s16, 2  ;;  %s904_s11 = sshll.u32 %s1421_s13, 1 }
   0xf   : > { %s1266_s24 = scalar_lea.vmem %s1414_s0, %s901_s21  ;;  %1119 = vmatpush3.bf16.msra.mxu0 %v1188_v2  ;;  %1172 = vmatpush3.bf16.msra.mxu1 %v1188_v2  ;;  %s1308_s10 = scalar_lea.vmem %s1416_s2, %s901_s21 }
  0x10   : > { %v1194_v4 = vld [vmem:[%s1266_s24] sm:$0xff]   ;;  %1120 = vmatprep.subr.bf16.mxu0 %v1189_v3  ;;  %1165 = vmatprep.subr.bf16.mxu1 %v1189_v3  ;;  %v1195_v10 = vld [vmem:[%s1266_s24 + $0x8] sm:$0xff]   ;;  %v1196_v12 = vld [vmem:[%s1266_s24 + $0x10] sm:$0xff]   ;;  %s184_s16 = scalar_lea.vmem %s1417_s3, %s904_s11 }
  0x11   : > { %1130 = vmatprep.mubr.bf16.mxu0 %v1194_v4  ;;  %v1202_v7 = vld [vmem:[%s1266_s24 + $0x40] sm:$0xff]   ;;  %v1203_v11 = vld [vmem:[%s1266_s24 + $0x48] sm:$0xff]   ;;  %v1204_v13 = vld [vmem:[%s1266_s24 + $0x50] sm:$0xff]  }
  0x12   : > { %1146 = vmatprep.mubr.bf16.mxu1 %v1202_v7  ;;  %v1197_v14 = vld [vmem:[%s1266_s24 + $0x18] sm:$0xff]   ;;  %v1198_v16 = vld [vmem:[%s1266_s24 + $0x20] sm:$0xff]   ;;  %v1199_v18 = vld [vmem:[%s1266_s24 + $0x28] sm:$0xff]  }
  0x13   : > { %1121 = vmatpush3.bf16.msra.mxu0 %v1189_v3  ;;  %1173 = vmatpush3.bf16.msra.mxu1 %v1189_v3  ;;  %v1205_v15 = vld [vmem:[%s1266_s24 + $0x58] sm:$0xff]   ;;  %v1206_v17 = vld [vmem:[%s1266_s24 + $0x60] sm:$0xff]   ;;  %v1207_v19 = vld [vmem:[%s1266_s24 + $0x68] sm:$0xff]  }
  0x14   : > { %1122 = vmatprep.subr.bf16.mxu0 %v1190_v5  ;;  %1166 = vmatprep.subr.bf16.mxu1 %v1190_v5  ;;  %v1200_v20 = vld [vmem:[%s1266_s24 + $0x30] sm:$0xff]   ;;  %v1201_v22 = vld [vmem:[%s1266_s24 + $0x38] sm:$0xff]  }
  0x15   : > { %v1208_v21 = vld [vmem:[%s1266_s24 + $0x70] sm:$0xff]   ;;  %v1209_v23 = vld [vmem:[%s1266_s24 + $0x78] sm:$0xff]  }
  0x17   : > { %1123 = vmatpush3.bf16.msra.mxu0 %v1190_v5  ;;  %1174 = vmatpush3.bf16.msra.mxu1 %v1190_v5 }
  0x18   : > { %1124 = vmatprep.subr.bf16.mxu0 %v1191_v6  ;;  %1167 = vmatprep.subr.bf16.mxu1 %v1191_v6 }
  0x1b   : > { %1125 = vmatpush3.bf16.msra.mxu0 %v1191_v6  ;;  %1175 = vmatpush3.bf16.msra.mxu1 %v1191_v6 }
  0x1c   : > { %1126 = vmatprep.subr.bf16.mxu0 %v1192_v8  ;;  %1168 = vmatprep.subr.bf16.mxu1 %v1192_v8 }
  0x1f   : > { %1127 = vmatpush3.bf16.msra.mxu0 %v1192_v8  ;;  %1176 = vmatpush3.bf16.msra.mxu1 %v1192_v8 }
  0x20   : > { %1128 = vmatprep.subr.bf16.mxu0 %v1193_v9  ;;  %1169 = vmatprep.subr.bf16.mxu1 %v1193_v9 }
  0x23   : > { %1129 = vmatpush3.bf16.msra.mxu0 %v1193_v9  ;;  %1177 = vmatpush3.bf16.msra.mxu1 %v1193_v9 }
  0x26   : > { %1131 = vmatmul.mubr.bf16.vlgmr.msra.gmra.mrb[0].mxu0 %v1195_v10  ;;  %1147 = vmatmul.mubr.bf16.vlgmr.msra.gmra.mrb[0].mxu1 %v1203_v11 }
  0x27   : > { %1134 = vmatprep.mubr.bf16.mxu0 %v1196_v12  ;;  %1150 = vmatprep.mubr.bf16.mxu1 %v1204_v13 }
  0x2e   : > { %1135 = vmatmul.mubr.bf16.gmra.mrb[4].mxu0 %v1197_v14  ;;  %1151 = vmatmul.mubr.bf16.gmra.mrb[4].mxu1 %v1205_v15 }
  0x2f   : > { %1138 = vmatprep.mubr.bf16.mxu0 %v1198_v16  ;;  %1154 = vmatprep.mubr.bf16.mxu1 %v1206_v17 }
  0x36   : > { %1139 = vmatmul.mubr.bf16.gmra.mrb[8].mxu0 %v1199_v18  ;;  %1155 = vmatmul.mubr.bf16.gmra.mrb[8].mxu1 %v1207_v19 }
  0x37   : > { %1142 = vmatprep.mubr.bf16.mxu0 %v1200_v20  ;;  %1158 = vmatprep.mubr.bf16.mxu1 %v1208_v21 }
  0x3e   : > { %1143 = vmatmul.mubr.bf16.gmra.mrb[12].mxu0 %v1201_v22  ;;  %1159 = vmatmul.mubr.bf16.gmra.mrb[12].mxu1 %v1209_v23 }
  0xf9   : > { %v1132_v24 = vpop.f32.mrb[0].mxu0  ;;  %v1299_v25 = vpop.f32.mrb[0].mxu1 }
  0xfa   : > { %v412_v26 = vpop.f32.mrb[1].mxu0  ;;  %v1301_v27 = vpop.f32.mrb[1].mxu1  ;;  %v738_v39 = vmul.f32 %v1132_v24, %v1132_v24 }
  0xfb   : > { %v1133_v28 = vpop.f32.mrb[2].mxu0  ;;  %v1310_v29 = vpop.f32.mrb[2].mxu1  ;;  %v736_v30 = vmul.f32 %v412_v26, %v412_v26 }
  0xfc   : > { %v1003_v31 = vpack.c.bf16 %v1133_v28, %v1132_v24  ;;  %v415_v32 = vpop.f32.mrb[3].mxu0  ;;  %v1043_v33 = vpack.c.bf16 %v1310_v29, %v1299_v25  ;;  %v1314_v34 = vpop.f32.mrb[3].mxu1  ;;  %v739_v42 = vmul.f32 %v1133_v28, %v1133_v28 }
  0xfd   : > { %v998_v35 = vpack.c.bf16 %v415_v32, %v412_v26  ;;  %v699_v36 = vadd.f32 %v415_v32, %v412_v26  ;;  %v737_v37 = vmul.f32 %v415_v32, %v415_v32  ;;  %v1038_v38 = vpack.c.bf16 %v1314_v34, %v1301_v27 }
  0xfe   : > { %1075 = vst [vmem:[%s1308_s10 + $0x8] sm:$0xff] %v1003_v31   ;;  %1083 = vst [vmem:[%s1308_s10 + $0x48] sm:$0xff] %v1043_v33  }
  0xff   : > { %999 = vst [vmem:[%s1308_s10] sm:$0xff] %v998_v35   ;;  %v700_v40 = vadd.f32 %v1132_v24, %v699_v36  ;;  %v768_v41 = vadd.f32 %v737_v37, %v736_v30  ;;  %1082 = vst [vmem:[%s1308_s10 + $0x40] sm:$0xff] %v1038_v38  }
 0x101   : > { %v769_v43 = vadd.f32 %v768_v41, %v738_v39  ;;  %v1136_v44 = vpop.f32.mrb[4].mxu0  ;;  %v701_v45 = vadd.f32 %v1133_v28, %v700_v40  ;;  %v1322_v46 = vpop.f32.mrb[4].mxu1 }
 0x102   : > { %v428_v47 = vpop.f32.mrb[5].mxu0  ;;  %v1324_v48 = vpop.f32.mrb[5].mxu1  ;;  %v742_v63 = vmul.f32 %v1136_v44, %v1136_v44 }
 0x103   : > { %v702_v49 = vadd.f32 %v701_v45, %v428_v47  ;;  %v740_v50 = vmul.f32 %v428_v47, %v428_v47  ;;  %v770_v51 = vadd.f32 %v769_v43, %v739_v42  ;;  %v1137_v52 = vpop.f32.mrb[6].mxu0  ;;  %v1326_v53 = vpop.f32.mrb[6].mxu1 }
 0x104   : > { %v1013_v54 = vpack.c.bf16 %v1137_v52, %v1136_v44  ;;  %v431_v55 = vpop.f32.mrb[7].mxu0  ;;  %v1053_v56 = vpack.c.bf16 %v1326_v53, %v1322_v46  ;;  %v1330_v57 = vpop.f32.mrb[7].mxu1  ;;  %v743_v2 = vmul.f32 %v1137_v52, %v1137_v52 }
 0x105   : > { %v771_v58 = vadd.f32 %v770_v51, %v740_v50  ;;  %v1008_v59 = vpack.c.bf16 %v431_v55, %v428_v47  ;;  %v703_v60 = vadd.f32 %v702_v49, %v431_v55  ;;  %v741_v61 = vmul.f32 %v431_v55, %v431_v55 }
 0x106   : > { %1077 = vst [vmem:[%s1308_s10 + $0x18] sm:$0xff] %v1013_v54   ;;  %1085 = vst [vmem:[%s1308_s10 + $0x58] sm:$0xff] %v1053_v56   ;;  %v1048_v62 = vpack.c.bf16 %v1330_v57, %v1324_v48 }
 0x107   : > { %1076 = vst [vmem:[%s1308_s10 + $0x10] sm:$0xff] %v1008_v59   ;;  %v704_v0 = vadd.f32 %v1136_v44, %v703_v60  ;;  %v772_v1 = vadd.f32 %v771_v58, %v741_v61  ;;  %v752_v61 = vmul.f32 %v1301_v27, %v1301_v27 }
 0x108   : > { %1084 = vst [vmem:[%s1308_s10 + $0x50] sm:$0xff] %v1048_v62  }
 0x109   : > { %v773_v3 = vadd.f32 %v772_v1, %v742_v63  ;;  %v1140_v4 = vpop.f32.mrb[8].mxu0  ;;  %v705_v5 = vadd.f32 %v1137_v52, %v704_v0  ;;  %v1338_v6 = vpop.f32.mrb[8].mxu1 }
 0x10a   : > { %v444_v7 = vpop.f32.mrb[9].mxu0  ;;  %v1340_v8 = vpop.f32.mrb[9].mxu1  ;;  %v746_v23 = vmul.f32 %v1140_v4, %v1140_v4 }
 0x10b   : > { %v706_v9 = vadd.f32 %v705_v5, %v444_v7  ;;  %v744_v10 = vmul.f32 %v444_v7, %v444_v7  ;;  %v774_v11 = vadd.f32 %v773_v3, %v743_v2  ;;  %v1141_v12 = vpop.f32.mrb[10].mxu0  ;;  %v1342_v13 = vpop.f32.mrb[10].mxu1  ;;  %v753_v2 = vmul.f32 %v1314_v34, %v1314_v34 }
 0x10c   : > { %v1023_v14 = vpack.c.bf16 %v1141_v12, %v1140_v4  ;;  %v447_v15 = vpop.f32.mrb[11].mxu0  ;;  %v1063_v16 = vpack.c.bf16 %v1342_v13, %v1338_v6  ;;  %v1346_v17 = vpop.f32.mrb[11].mxu1  ;;  %v747_v28 = vmul.f32 %v1141_v12, %v1141_v12  ;;  %v754_v3 = vmul.f32 %v1299_v25, %v1299_v25 }
 0x10d   : > { %v775_v18 = vadd.f32 %v774_v11, %v744_v10  ;;  %v1018_v19 = vpack.c.bf16 %v447_v15, %v444_v7  ;;  %v707_v20 = vadd.f32 %v706_v9, %v447_v15  ;;  %v745_v21 = vmul.f32 %v447_v15, %v447_v15 }
 0x10e   : > { %1079 = vst [vmem:[%s1308_s10 + $0x28] sm:$0xff] %v1023_v14   ;;  %1087 = vst [vmem:[%s1308_s10 + $0x68] sm:$0xff] %v1063_v16   ;;  %v1058_v22 = vpack.c.bf16 %v1346_v17, %v1340_v8  ;;  %v755_v7 = vmul.f32 %v1310_v29, %v1310_v29  ;;  %v757_v15 = vmul.f32 %v1330_v57, %v1330_v57 }
 0x10f   : > { %1078 = vst [vmem:[%s1308_s10 + $0x20] sm:$0xff] %v1018_v19   ;;  %v708_v24 = vadd.f32 %v1140_v4, %v707_v20  ;;  %v776_v26 = vadd.f32 %v775_v18, %v745_v21 }
 0x110   : > { %1086 = vst [vmem:[%s1308_s10 + $0x60] sm:$0xff] %v1058_v22  }
 0x111   : > { %v777_v30 = vadd.f32 %v776_v26, %v746_v23  ;;  %v1144_v31 = vpop.f32.mrb[12].mxu0  ;;  %v709_v32 = vadd.f32 %v1141_v12, %v708_v24  ;;  %v1354_v33 = vpop.f32.mrb[12].mxu1  ;;  %v761_v24 = vmul.f32 %v1346_v17, %v1346_v17 }
 0x112   : > { %v460_v35 = vpop.f32.mrb[13].mxu0  ;;  %v524_v36 = vpop.f32.mrb[13].mxu1  ;;  %v750_v54 = vmul.f32 %v1144_v31, %v1144_v31 }
 0x113   : > { %v710_v37 = vadd.f32 %v709_v32, %v460_v35  ;;  %v748_v38 = vmul.f32 %v460_v35, %v460_v35  ;;  %v778_v39 = vadd.f32 %v777_v30, %v747_v28  ;;  %v1145_v40 = vpop.f32.mrb[14].mxu0  ;;  %v1356_v41 = vpop.f32.mrb[14].mxu1 }
 0x114   : > { %v1033_v42 = vpack.c.bf16 %v1145_v40, %v1144_v31  ;;  %v463_v43 = vpop.f32.mrb[15].mxu0  ;;  %v1073_v44 = vpack.c.bf16 %v1356_v41, %v1354_v33  ;;  %v527_v45 = vpop.f32.mrb[15].mxu1  ;;  %v751_v58 = vmul.f32 %v1145_v40, %v1145_v40 }
 0x115   : > { %v779_v47 = vadd.f32 %v778_v39, %v748_v38  ;;  %v1028_v49 = vpack.c.bf16 %v463_v43, %v460_v35  ;;  %v711_v50 = vadd.f32 %v710_v37, %v463_v43  ;;  %v749_v51 = vmul.f32 %v463_v43, %v463_v43 }
 0x116   : > { %1081 = vst [vmem:[%s1308_s10 + $0x38] sm:$0xff] %v1033_v42   ;;  %1089 = vst [vmem:[%s1308_s10 + $0x78] sm:$0xff] %v1073_v44   ;;  %v1068_v52 = vpack.c.bf16 %v527_v45, %v524_v36  ;;  %v766_v39 = vmul.f32 %v1354_v33, %v1354_v33  ;;  %v767_v42 = vmul.f32 %v1356_v41, %v1356_v41 }
 0x117   : > { %1080 = vst [vmem:[%s1308_s10 + $0x30] sm:$0xff] %v1028_v49   ;;  %v712_v55 = vadd.f32 %v1144_v31, %v711_v50  ;;  %v780_v56 = vadd.f32 %v779_v47, %v749_v51  ;;  %v764_v31 = vmul.f32 %v524_v36, %v524_v36 }
 0x118   : > { %1088 = vst [vmem:[%s1308_s10 + $0x70] sm:$0xff] %v1068_v52  }
 0x119   : > { %v781_v59 = vadd.f32 %v780_v56, %v750_v54  ;;  %v713_v60 = vadd.f32 %v1145_v40, %v712_v55 }
 0x11b   : > { %v714_v62 = vadd.f32 %v713_v60, %v1301_v27  ;;  %v782_v63 = vadd.f32 %v781_v59, %v751_v58  ;;  %v756_v27 = vmul.f32 %v1324_v48, %v1324_v48 }
 0x11d   : > { %v783_v0 = vadd.f32 %v782_v63, %v752_v61  ;;  %v715_v1 = vadd.f32 %v714_v62, %v1314_v34 }
 0x11f   : > { %v716_v4 = vadd.f32 %v1299_v25, %v715_v1  ;;  %v784_v5 = vadd.f32 %v783_v0, %v753_v2  ;;  %v758_v25 = vmul.f32 %v1322_v46, %v1322_v46 }
 0x121   : > { %v785_v9 = vadd.f32 %v784_v5, %v754_v3  ;;  %v717_v10 = vadd.f32 %v1310_v29, %v716_v4  ;;  %v759_v29 = vmul.f32 %v1326_v53, %v1326_v53 }
 0x123   : > { %v718_v11 = vadd.f32 %v717_v10, %v1324_v48  ;;  %v786_v12 = vadd.f32 %v785_v9, %v755_v7  ;;  %v760_v48 = vmul.f32 %v1340_v8, %v1340_v8 }
 0x125   : > { %v787_v14 = vadd.f32 %v786_v12, %v756_v27  ;;  %v719_v34 = vadd.f32 %v718_v11, %v1330_v57 }
 0x127   : > { %v720_v16 = vadd.f32 %v1322_v46, %v719_v34  ;;  %v788_v18 = vadd.f32 %v787_v14, %v757_v15  ;;  %v762_v46 = vmul.f32 %v1338_v6, %v1338_v6 }
 0x129   : > { %v789_v19 = vadd.f32 %v788_v18, %v758_v25  ;;  %v721_v20 = vadd.f32 %v1326_v53, %v720_v16  ;;  %v763_v53 = vmul.f32 %v1342_v13, %v1342_v13 }
 0x12b   : > { %v722_v21 = vadd.f32 %v721_v20, %v1340_v8  ;;  %v790_v22 = vadd.f32 %v789_v19, %v759_v29 }
 0x12d   : > { %v791_v23 = vadd.f32 %v790_v22, %v760_v48  ;;  %v723_v57 = vadd.f32 %v722_v21, %v1346_v17  ;;  %v765_v17 = vmul.f32 %v527_v45, %v527_v45 }
 0x12f   : > { %v724_v26 = vadd.f32 %v1338_v6, %v723_v57  ;;  %v792_v28 = vadd.f32 %v791_v23, %v761_v24 }
 0x131   : > { %v793_v30 = vadd.f32 %v792_v28, %v762_v46  ;;  %v725_v8 = vadd.f32 %v1342_v13, %v724_v26 }
 0x133   : > { %v726_v32 = vadd.f32 %v725_v8, %v524_v36  ;;  %v794_v35 = vadd.f32 %v793_v30, %v763_v53 }
 0x135   : > { %v795_v37 = vadd.f32 %v794_v35, %v764_v31  ;;  %v727_v38 = vadd.f32 %v726_v32, %v527_v45 }
 0x137   : > { %v728_v6 = vadd.f32 %v1354_v33, %v727_v38  ;;  %v796_v40 = vadd.f32 %v795_v37, %v765_v17 }
 0x139   : > { %v729_v43 = vadd.f32 %v1356_v41, %v728_v6  ;;  %v797_v44 = vadd.f32 %v796_v40, %v766_v39 }
 0x13b   : > { %v730_v13 = vrot.slane %v729_v43, 4  ;;  %v798_v47 = vadd.f32 %v797_v44, %v767_v42 }
 0x13d   : > { %v731_v36 = vadd.f32 %v730_v13, %v729_v43  ;;  %v799_v49 = vrot.slane %v798_v47, 4 }
 0x13f   : > { %v732_v50 = vrot.slane %v731_v36, 2  ;;  %v800_v51 = vadd.f32 %v799_v49, %v798_v47 }
 0x141   : > { %v733_v45 = vadd.f32 %v732_v50, %v731_v36  ;;  %v801_v52 = vrot.slane %v800_v51, 2 }
 0x143   : > { %v734_v54 = vrot.slane %v733_v45, 1  ;;  %v802_v55 = vadd.f32 %v801_v52, %v800_v51 }
 0x145   : > { %v803_v33 = vrot.slane %v802_v55, 1  ;;  %v735_v41 = vadd.f32 %v734_v54, %v733_v45 }
 0x147   : > { %v804_v56 = vadd.f32 %v803_v33, %v802_v55 }
 0x149   : > { %v806_v58 = vsel %vm805_vm0, %v735_v41, %v804_v56 }
 0x14a   : > { %807 = vst [vmem:[%s184_s16] sm:$0x3] %v806_v58 }
 0x14b PF: > { %s14_s12 = sadd.s32 1, %s1216_s12  }
 0x14c   : > { %p11_p5 = scmp.ge.s32.totalorder %s14_s12, 4  }
 0x14e   :  { %13 = sbr.rel (!%p11_p5) target bundleno = 1 (0x1), region = 70 }

// kernel: basic_block_forward.5
= control target key start
LH: loop header
LB: loop body
LE: loop exit
PB: predicated region body
PF: predicated region fallthrough
CT: control target
= control target key end

     0   :  { %s807_s15 = smov 0   ;;  %s979_s0 = inlined_call_operand.vmem [shape: bf16[512,128], index: 0, kind: input, shape index: {}]   ;;  %s980_s1 = inlined_call_operand.vmem [shape: f32[1,128], index: 1, kind: input, shape index: {}]   ;;  %s981_s2 = inlined_call_operand.vmem [shape: f32[1,128], index: 2, kind: input, shape index: {}]   ;;  %s982_s3 = inlined_call_operand.vmem [shape: bf16[512,128], index: 3, kind: input, shape index: {}]   ;;  %s983_s4 = inlined_call_operand.vmem [shape: f32[512,128], index: 4, kind: output, shape index: {}]  }
   0x1 LB: > { %s593_s16 = sadd.s32 4294967295, %s780_s15   ;;  %p597_p0 = scmp.ge.s32.totalorder %s780_s15, 1  ;;  %s780_s15 = sphi %s807_s15, %s14_s15  }
   0x2   : > { %p174_p1 = scmp.lt.s32.totalorder %s780_s15, 3 }
   0x4   : > { %p175_p2 = pnand %p597_p0, %p174_p1 }
   0x5   : > { %s598_s17 = sshll.u32 (!%p175_p2), %s593_s16, 5  ;;  %v831_v0 = vld [vmem:[%s980_s1] ss:$0 sm:$0xff] (!%p175_p2) }
   0x6   : > { %178 = sbr.rel (%p175_p2) target bundleno = 71 (0x47), region = 36  ;;  %p206_p3 = scmp.lt.s32.totalorder (!%p175_p2), %s598_s17, 63  ;;  %v842_v11 = vld [vmem:[%s981_s2] ss:$0 sm:$0xff] (!%p175_p2) }
   0xd   : > { %s985_s17 = smov (!%p206_p3, %s598_s17), 63 }
   0xe   : > { %s599_s18 = sshll.u32 %s985_s17, 2  ;;  %s603_s29 = sshll.u32 %s985_s17, 3 }
   0xf   : > { %s821_s21 = scalar_lea.vmem %s979_s0, %s599_s18  ;;  %s826_s24 = scalar_lea.vmem %s982_s3, %s599_s18 }
  0x10   : > { %v609_v1 = vld [vmem:[%s821_s21] sm:$0xff]   ;;  %v736_v3 = vld [vmem:[%s821_s21 + $0x8] sm:$0xff]   ;;  %v737_v9 = vld [vmem:[%s821_s21 + $0x10] sm:$0xff]   ;;  %s865_s6 = scalar_lea.vmem %s983_s4, %s603_s29 }
  0x11   : > { %v673_v2 = vld [vmem:[%s826_s24] sm:$0xff]   ;;  %v610_v4 = vunpack.c.l.bf16 %v609_v1  ;;  %v611_v6 = vunpack.c.h.bf16 %v609_v1  ;;  %v751_v8 = vld [vmem:[%s826_s24 + $0x8] sm:$0xff]   ;;  %v752_v10 = vld [vmem:[%s826_s24 + $0x10] sm:$0xff]   ;;  %v614_v12 = vunpack.c.l.bf16 %v736_v3  ;;  %v615_v14 = vunpack.c.h.bf16 %v736_v3 }
  0x12   : > { %v674_v5 = vunpack.c.l.bf16 %v673_v2  ;;  %v675_v7 = vunpack.c.h.bf16 %v673_v2  ;;  %v678_v13 = vunpack.c.l.bf16 %v751_v8  ;;  %v679_v15 = vunpack.c.h.bf16 %v751_v8  ;;  %v738_v16 = vld [vmem:[%s821_s21 + $0x18] sm:$0xff]   ;;  %v739_v42 = vld [vmem:[%s821_s21 + $0x20] sm:$0xff]   ;;  %v740_v52 = vld [vmem:[%s821_s21 + $0x28] sm:$0xff]  }
  0x13   : > { %v294_v17 = vmul.f32 %v610_v4, %v831_v0  ;;  %v295_v18 = vmul.f32 %v611_v6, %v831_v0  ;;  %v618_v19 = vunpack.c.l.bf16 %v737_v9  ;;  %v682_v20 = vunpack.c.l.bf16 %v752_v10  ;;  %v848_v21 = vld [vmem:[%s826_s24 + $0x18] sm:$0xff]   ;;  %v754_v51 = vld [vmem:[%s826_s24 + $0x20] sm:$0xff]   ;;  %v755_v60 = vld [vmem:[%s826_s24 + $0x28] sm:$0xff]  }
  0x14   : > { %v296_v22 = vmul.f32 %v614_v12, %v831_v0  ;;  %v297_v23 = vmul.f32 %v615_v14, %v831_v0  ;;  %v619_v24 = vunpack.c.h.bf16 %v737_v9  ;;  %v683_v25 = vunpack.c.h.bf16 %v752_v10  ;;  %v741_v61 = vld [vmem:[%s821_s21 + $0x30] sm:$0xff]  }
  0x15   : > { %v333_v26 = vadd.f32 %v842_v11, %v294_v17  ;;  %v334_v27 = vadd.f32 %v842_v11, %v295_v18  ;;  %v298_v28 = vmul.f32 %v618_v19, %v831_v0  ;;  %v622_v29 = vunpack.c.l.bf16 %v738_v16  ;;  %v756_v12 = vld [vmem:[%s826_s24 + $0x30] sm:$0xff]  }
  0x16   : > { %v335_v30 = vadd.f32 %v842_v11, %v296_v22  ;;  %v336_v31 = vadd.f32 %v842_v11, %v297_v23  ;;  %v299_v32 = vmul.f32 %v619_v24, %v831_v0  ;;  %v686_v33 = vunpack.c.l.bf16 %v848_v21 }
  0x17   : > { %v365_v34 = vmax.f32 %v333_v26, 0.0  ;;  %v366_v35 = vmax.f32 %v334_v27, 0.0  ;;  %v337_v36 = vadd.f32 %v842_v11, %v298_v28  ;;  %v300_v37 = vmul.f32 %v622_v29, %v831_v0 }
  0x18   : > { %v367_v38 = vmax.f32 %v335_v30, 0.0  ;;  %v368_v39 = vmax.f32 %v336_v31, 0.0  ;;  %v338_v40 = vadd.f32 %v842_v11, %v299_v32  ;;  %v623_v41 = vunpack.c.h.bf16 %v738_v16  ;;  %v757_v30 = vld [vmem:[%s826_s24 + $0x38] sm:$0xff]   ;;  %v743_v31 = vld [vmem:[%s821_s21 + $0x40] sm:$0xff]  }
  0x19   : > { %v461_v43 = vadd.f32 %v674_v5, %v365_v34  ;;  %v462_v44 = vadd.f32 %v675_v7, %v366_v35  ;;  %v369_v45 = vmax.f32 %v337_v36, 0.0  ;;  %v339_v46 = vadd.f32 %v842_v11, %v300_v37 }
  0x1a   : > { %v463_v47 = vadd.f32 %v678_v13, %v367_v38  ;;  %v464_v48 = vadd.f32 %v679_v15, %v368_v39  ;;  %v370_v49 = vmax.f32 %v338_v40, 0.0  ;;  %v301_v50 = vmul.f32 %v623_v41, %v831_v0  ;;  %v742_v13 = vld [vmem:[%s821_s21 + $0x38] sm:$0xff]   ;;  %v758_v40 = vld [vmem:[%s826_s24 + $0x40] sm:$0xff]  }
  0x1b   : > { %493 = vst [vmem:[%s865_s6] sm:$0xff] %v461_v43  ;;  %494 = vst [vmem:[%s865_s6 + $0x8] sm:$0xff] %v462_v44  ;;  %v465_v53 = vadd.f32 %v682_v20, %v369_v45  ;;  %v371_v54 = vmax.f32 %v339_v46, 0.0  ;;  %v626_v55 = vunpack.c.l.bf16 %v739_v42  ;;  %v687_v58 = vunpack.c.h.bf16 %v848_v21  ;;  %v744_v45 = vld [vmem:[%s821_s21 + $0x48] sm:$0xff]  }
  0x1c   : > { %495 = vst [vmem:[%s865_s6 + $0x10] sm:$0xff] %v463_v47  ;;  %496 = vst [vmem:[%s865_s6 + $0x18] sm:$0xff] %v464_v48  ;;  %v466_v56 = vadd.f32 %v683_v25, %v370_v49  ;;  %v340_v57 = vadd.f32 %v842_v11, %v301_v50  ;;  %v627_v59 = vunpack.c.h.bf16 %v739_v42  ;;  %v690_v1 = vunpack.c.l.bf16 %v754_v51 }
  0x1d   : > { %497 = vst [vmem:[%s865_s6 + $0x20] sm:$0xff] %v465_v53  ;;  %v467_v62 = vadd.f32 %v686_v33, %v371_v54  ;;  %v302_v63 = vmul.f32 %v626_v55, %v831_v0  ;;  %v630_v2 = vunpack.c.l.bf16 %v740_v52  ;;  %v691_v5 = vunpack.c.h.bf16 %v754_v51  ;;  %v759_v54 = vld [vmem:[%s826_s24 + $0x48] sm:$0xff]   ;;  %v745_v55 = vld [vmem:[%s821_s21 + $0x50] sm:$0xff]  }
  0x1e   : > { %498 = vst [vmem:[%s865_s6 + $0x28] sm:$0xff] %v466_v56  ;;  %v372_v3 = vmax.f32 %v340_v57, 0.0  ;;  %v303_v4 = vmul.f32 %v627_v59, %v831_v0  ;;  %v631_v6 = vunpack.c.h.bf16 %v740_v52  ;;  %v694_v9 = vunpack.c.l.bf16 %v755_v60 }
  0x1f   : > { %499 = vst [vmem:[%s865_s6 + $0x30] sm:$0xff] %v467_v62  ;;  %v341_v7 = vadd.f32 %v842_v11, %v302_v63  ;;  %v304_v8 = vmul.f32 %v630_v2, %v831_v0  ;;  %v634_v10 = vunpack.c.l.bf16 %v741_v61  ;;  %v695_v17 = vunpack.c.h.bf16 %v755_v60 }
  0x20   : > { %v468_v14 = vadd.f32 %v687_v58, %v372_v3  ;;  %v342_v15 = vadd.f32 %v842_v11, %v303_v4  ;;  %v305_v16 = vmul.f32 %v631_v6, %v831_v0  ;;  %v635_v21 = vunpack.c.h.bf16 %v741_v61 }
  0x21   : > { %v373_v18 = vmax.f32 %v341_v7, 0.0  ;;  %v343_v19 = vadd.f32 %v842_v11, %v304_v8  ;;  %v306_v20 = vmul.f32 %v634_v10, %v831_v0  ;;  %v698_v24 = vunpack.c.l.bf16 %v756_v12  ;;  %v746_v10 = vld [vmem:[%s821_s21 + $0x58] sm:$0xff]  }
  0x22   : > { %500 = vst [vmem:[%s865_s6 + $0x38] sm:$0xff] %v468_v14  ;;  %v374_v22 = vmax.f32 %v342_v15, 0.0  ;;  %v344_v23 = vadd.f32 %v842_v11, %v305_v16  ;;  %v638_v25 = vunpack.c.l.bf16 %v742_v13  ;;  %v307_v29 = vmul.f32 %v635_v21, %v831_v0 }
  0x23   : > { %v469_v26 = vadd.f32 %v690_v1, %v373_v18  ;;  %v375_v27 = vmax.f32 %v343_v19, 0.0  ;;  %v345_v28 = vadd.f32 %v842_v11, %v306_v20  ;;  %v699_v34 = vunpack.c.h.bf16 %v756_v12 }
  0x24   : > { %v470_v32 = vadd.f32 %v691_v5, %v374_v22  ;;  %v376_v33 = vmax.f32 %v344_v23, 0.0  ;;  %v308_v35 = vmul.f32 %v638_v25, %v831_v0  ;;  %v346_v38 = vadd.f32 %v842_v11, %v307_v29  ;;  %v760_v5 = vld [vmem:[%s826_s24 + $0x50] sm:$0xff]   ;;  %v747_v25 = vld [vmem:[%s821_s21 + $0x60] sm:$0xff]  }
  0x25   : > { %501 = vst [vmem:[%s865_s6 + $0x40] sm:$0xff] %v469_v26  ;;  %v471_v36 = vadd.f32 %v694_v9, %v375_v27  ;;  %v377_v37 = vmax.f32 %v345_v28, 0.0  ;;  %v639_v39 = vunpack.c.h.bf16 %v742_v13  ;;  %v702_v43 = vunpack.c.l.bf16 %v757_v30 }
  0x26   : > { %502 = vst [vmem:[%s865_s6 + $0x48] sm:$0xff] %v470_v32  ;;  %v472_v41 = vadd.f32 %v695_v17, %v376_v33  ;;  %v347_v42 = vadd.f32 %v842_v11, %v308_v35  ;;  %v642_v44 = vunpack.c.l.bf16 %v743_v31  ;;  %v378_v47 = vmax.f32 %v346_v38, 0.0 }
  0x27   : > { %503 = vst [vmem:[%s865_s6 + $0x50] sm:$0xff] %v471_v36  ;;  %v473_v46 = vadd.f32 %v698_v24, %v377_v37  ;;  %v309_v48 = vmul.f32 %v639_v39, %v831_v0  ;;  %v703_v49 = vunpack.c.h.bf16 %v757_v30  ;;  %v706_v52 = vunpack.c.l.bf16 %v758_v40  ;;  %v761_v24 = vld [vmem:[%s826_s24 + $0x58] sm:$0xff]   ;;  %v748_v39 = vld [vmem:[%s821_s21 + $0x68] sm:$0xff]  }
  0x28   : > { %504 = vst [vmem:[%s865_s6 + $0x58] sm:$0xff] %v472_v41  ;;  %v379_v50 = vmax.f32 %v347_v42, 0.0  ;;  %v310_v51 = vmul.f32 %v642_v44, %v831_v0  ;;  %v643_v53 = vunpack.c.h.bf16 %v743_v31  ;;  %v474_v56 = vadd.f32 %v699_v34, %v378_v47  ;;  %v762_v34 = vld [vmem:[%s826_s24 + $0x60] sm:$0xff]  }
  0x29   : > { %505 = vst [vmem:[%s865_s6 + $0x60] sm:$0xff] %v473_v46  ;;  %v348_v57 = vadd.f32 %v842_v11, %v309_v48  ;;  %v707_v58 = vunpack.c.h.bf16 %v758_v40  ;;  %v646_v59 = vunpack.c.l.bf16 %v744_v45  ;;  %v647_v63 = vunpack.c.h.bf16 %v744_v45  ;;  %v763_v48 = vld [vmem:[%s826_s24 + $0x68] sm:$0xff]  }
  0x2a   : > { %v475_v60 = vadd.f32 %v702_v43, %v379_v50  ;;  %v349_v61 = vadd.f32 %v842_v11, %v310_v51  ;;  %v311_v62 = vmul.f32 %v643_v53, %v831_v0  ;;  %506 = vst [vmem:[%s865_s6 + $0x68] sm:$0xff] %v474_v56  ;;  %v710_v3 = vunpack.c.l.bf16 %v759_v54 }
  0x2b   : > { %v380_v1 = vmax.f32 %v348_v57, 0.0  ;;  %v312_v2 = vmul.f32 %v646_v59, %v831_v0  ;;  %v650_v4 = vunpack.c.l.bf16 %v745_v55  ;;  %v313_v8 = vmul.f32 %v647_v63, %v831_v0 }
  0x2c   : > { %507 = vst [vmem:[%s865_s6 + $0x70] sm:$0xff] %v475_v60  ;;  %v381_v6 = vmax.f32 %v349_v61, 0.0  ;;  %v350_v7 = vadd.f32 %v842_v11, %v311_v62  ;;  %v711_v9 = vunpack.c.h.bf16 %v759_v54  ;;  %v651_v15 = vunpack.c.h.bf16 %v745_v55  ;;  %v764_v62 = vld [vmem:[%s826_s24 + $0x70] sm:$0xff]  }
  0x2d   : > { %v476_v12 = vadd.f32 %v703_v49, %v380_v1  ;;  %v351_v13 = vadd.f32 %v842_v11, %v312_v2  ;;  %v314_v14 = vmul.f32 %v650_v4, %v831_v0  ;;  %v352_v18 = vadd.f32 %v842_v11, %v313_v8  ;;  %v749_v49 = vld [vmem:[%s821_s21 + $0x70] sm:$0xff]   ;;  %v750_v4 = vld [vmem:[%s821_s21 + $0x78] sm:$0xff]  }
  0x2e   : > { %v477_v16 = vadd.f32 %v706_v52, %v381_v6  ;;  %v382_v17 = vmax.f32 %v350_v7, 0.0  ;;  %v714_v19 = vunpack.c.l.bf16 %v760_v5  ;;  %v315_v22 = vmul.f32 %v651_v15, %v831_v0 }
  0x2f   : > { %508 = vst [vmem:[%s865_s6 + $0x78] sm:$0xff] %v476_v12  ;;  %v383_v20 = vmax.f32 %v351_v13, 0.0  ;;  %v353_v21 = vadd.f32 %v842_v11, %v314_v14  ;;  %v654_v23 = vunpack.c.l.bf16 %v746_v10  ;;  %v384_v27 = vmax.f32 %v352_v18, 0.0 }
  0x30   : > { %509 = vst [vmem:[%s865_s6 + $0x80] sm:$0xff] %v477_v16  ;;  %v478_v26 = vadd.f32 %v707_v58, %v382_v17  ;;  %v715_v28 = vunpack.c.h.bf16 %v760_v5  ;;  %v655_v29 = vunpack.c.h.bf16 %v746_v10  ;;  %v354_v32 = vadd.f32 %v842_v11, %v315_v22 }
  0x31   : > { %v479_v30 = vadd.f32 %v710_v3, %v383_v20  ;;  %v385_v31 = vmax.f32 %v353_v21, 0.0  ;;  %v316_v33 = vmul.f32 %v654_v23, %v831_v0  ;;  %v480_v35 = vadd.f32 %v711_v9, %v384_v27  ;;  %v765_v21 = vld [vmem:[%s826_s24 + $0x78] sm:$0xff]  }
  0x32   : > { %510 = vst [vmem:[%s865_s6 + $0x88] sm:$0xff] %v478_v26  ;;  %v718_v36 = vunpack.c.l.bf16 %v761_v24  ;;  %v317_v37 = vmul.f32 %v655_v29, %v831_v0  ;;  %v658_v38 = vunpack.c.l.bf16 %v747_v25  ;;  %v386_v41 = vmax.f32 %v354_v32, 0.0 }
  0x33   : > { %511 = vst [vmem:[%s865_s6 + $0x90] sm:$0xff] %v479_v30  ;;  %v481_v40 = vadd.f32 %v714_v19, %v385_v31  ;;  %v355_v42 = vadd.f32 %v842_v11, %v316_v33  ;;  %v719_v43 = vunpack.c.h.bf16 %v761_v24  ;;  %512 = vst [vmem:[%s865_s6 + $0x98] sm:$0xff] %v480_v35  ;;  %v722_v46 = vunpack.c.l.bf16 %v762_v34 }
  0x34   : > { %v356_v44 = vadd.f32 %v842_v11, %v317_v37  ;;  %v318_v45 = vmul.f32 %v658_v38, %v831_v0  ;;  %v659_v47 = vunpack.c.h.bf16 %v747_v25  ;;  %v482_v50 = vadd.f32 %v715_v28, %v386_v41 }
  0x35   : > { %513 = vst [vmem:[%s865_s6 + $0xa0] sm:$0xff] %v481_v40  ;;  %v387_v51 = vmax.f32 %v355_v42, 0.0  ;;  %v723_v52 = vunpack.c.h.bf16 %v762_v34  ;;  %v662_v53 = vunpack.c.l.bf16 %v748_v39  ;;  %v663_v57 = vunpack.c.h.bf16 %v748_v39 }
  0x36   : > { %v388_v54 = vmax.f32 %v356_v44, 0.0  ;;  %v357_v55 = vadd.f32 %v842_v11, %v318_v45  ;;  %v319_v56 = vmul.f32 %v659_v47, %v831_v0  ;;  %514 = vst [vmem:[%s865_s6 + $0xa8] sm:$0xff] %v482_v50  ;;  %v726_v60 = vunpack.c.l.bf16 %v763_v48 }
  0x37   : > { %v483_v58 = vadd.f32 %v718_v36, %v387_v51  ;;  %v320_v59 = vmul.f32 %v662_v53, %v831_v0  ;;  %v666_v61 = vunpack.c.l.bf16 %v749_v49  ;;  %v321_v3 = vmul.f32 %v663_v57, %v831_v0 }
  0x38   : > { %v484_v63 = vadd.f32 %v719_v43, %v388_v54  ;;  %v389_v1 = vmax.f32 %v357_v55, 0.0  ;;  %v358_v2 = vadd.f32 %v842_v11, %v319_v56  ;;  %v727_v6 = vunpack.c.h.bf16 %v763_v48 }
  0x39   : > { %515 = vst [vmem:[%s865_s6 + $0xb0] sm:$0xff] %v483_v58  ;;  %v359_v5 = vadd.f32 %v842_v11, %v320_v59  ;;  %v322_v7 = vmul.f32 %v666_v61, %v831_v0  ;;  %v667_v8 = vunpack.c.h.bf16 %v749_v49  ;;  %v360_v12 = vadd.f32 %v842_v11, %v321_v3 }
  0x3a   : > { %516 = vst [vmem:[%s865_s6 + $0xb8] sm:$0xff] %v484_v63  ;;  %v485_v9 = vadd.f32 %v722_v46, %v389_v1  ;;  %v390_v10 = vmax.f32 %v358_v2, 0.0  ;;  %v730_v13 = vunpack.c.l.bf16 %v764_v62  ;;  %v670_v17 = vunpack.c.l.bf16 %v750_v4 }
  0x3b   : > { %v391_v14 = vmax.f32 %v359_v5, 0.0  ;;  %v361_v15 = vadd.f32 %v842_v11, %v322_v7  ;;  %v323_v16 = vmul.f32 %v667_v8, %v831_v0  ;;  %v392_v19 = vmax.f32 %v360_v12, 0.0 }
  0x3c   : > { %517 = vst [vmem:[%s865_s6 + $0xc0] sm:$0xff] %v485_v9  ;;  %v486_v18 = vadd.f32 %v723_v52, %v390_v10  ;;  %v731_v20 = vunpack.c.h.bf16 %v764_v62  ;;  %v671_v22 = vunpack.c.h.bf16 %v750_v4  ;;  %v324_v26 = vmul.f32 %v670_v17, %v831_v0 }
  0x3d   : > { %v487_v23 = vadd.f32 %v726_v60, %v391_v14  ;;  %v393_v24 = vmax.f32 %v361_v15, 0.0  ;;  %v362_v25 = vadd.f32 %v842_v11, %v323_v16  ;;  %v488_v27 = vadd.f32 %v727_v6, %v392_v19 }
  0x3e   : > { %518 = vst [vmem:[%s865_s6 + $0xc8] sm:$0xff] %v486_v18  ;;  %v325_v28 = vmul.f32 %v671_v22, %v831_v0  ;;  %v363_v31 = vadd.f32 %v842_v11, %v324_v26  ;;  %v734_v32 = vunpack.c.l.bf16 %v765_v21  ;;  %v735_v34 = vunpack.c.h.bf16 %v765_v21 }
  0x3f   : > { %519 = vst [vmem:[%s865_s6 + $0xd0] sm:$0xff] %v487_v23  ;;  %v489_v29 = vadd.f32 %v730_v13, %v393_v24  ;;  %v394_v30 = vmax.f32 %v362_v25, 0.0  ;;  %520 = vst [vmem:[%s865_s6 + $0xd8] sm:$0xff] %v488_v27 }
  0x40   : > { %v364_v33 = vadd.f32 %v842_v11, %v325_v28  ;;  %v395_v36 = vmax.f32 %v363_v31, 0.0 }
  0x41   : > { %521 = vst [vmem:[%s865_s6 + $0xe0] sm:$0xff] %v489_v29  ;;  %v490_v35 = vadd.f32 %v731_v20, %v394_v30 }
  0x42   : > { %v396_v37 = vmax.f32 %v364_v33, 0.0  ;;  %v491_v38 = vadd.f32 %v734_v32, %v395_v36 }
  0x43   : > { %522 = vst [vmem:[%s865_s6 + $0xe8] sm:$0xff] %v490_v35 }
  0x44   : > { %v492_v39 = vadd.f32 %v735_v34, %v396_v37  ;;  %523 = vst [vmem:[%s865_s6 + $0xf0] sm:$0xff] %v491_v38 }
  0x46   : > { %524 = vst [vmem:[%s865_s6 + $0xf8] sm:$0xff] %v492_v39 }
  0x47 PF: > { %s14_s15 = sadd.s32 1, %s780_s15  }
  0x48   : > { %p11_p4 = scmp.ge.s32.totalorder %s14_s15, 4  }
  0x4a   :  { %13 = sbr.rel (!%p11_p4) target bundleno = 1 (0x1), region = 69 }

</bundles_post_ra>
